<compile_context>
chip_gen: v7x
topology: tpu7x:2x2x1
jax: 0.10.0
libtpu: 0.0.40
codegen_flags: <defaults>
</compile_context>

<pallas_src>
import functools

import jax
import jax.numpy as jnp
from jax.experimental import pallas as pl
from jax.experimental.pallas import tpu as pltpu


# ----------------------------------------------------------------------------
# Sizing helpers
# ----------------------------------------------------------------------------

def _round_up(x, m):
    return (x + m - 1) // m * m


def _vmem_budget_bytes():
    """Generation-aware VMEM budget: ~75% of physical (~96 MiB on 128-MiB
    v5e/v6e, ~48 MiB on 64-MiB v7x), leaving headroom for Mosaic scratch."""
    cap = 64 * 1024 * 1024
    try:
        info = pltpu.get_tpu_info()
        cap = int(getattr(info, "vmem_capacity_bytes", cap))
    except Exception:
        pass
    return max(min(int(cap * 0.75), cap - 16 * 1024 * 1024), 16 * 1024 * 1024)


def _vmem_estimate(Mp, H, Dh, tn):
    """Rough VMEM bytes used by the fused kernel at output-tile width tn."""
    return (2 * Mp * H * 2        # x (bf16, resident, double-buffered)
            + 2 * H * Dh * 2      # w1 (bf16, resident)
            + 2 * 8 * Dh * 4      # b1 (f32, sublane-padded)
            + 2 * Dh * tn * 2     # w2 tile stream (bf16, double-buffered)
            + 2 * 8 * tn * 4      # b2 tile (f32)
            + 2 * Mp * tn * 4     # f32 output tile (double-buffered)
            + Mp * Dh * 2)        # h scratch (bf16)


_TN_CANDIDATES = (8192, 4096, 2048, 1024, 512, 256, 128)
# ~0.35 us per grid step expressed in HBM-byte equivalents (~1.4 TB/s).
_STEP_OVERHEAD_BYTES = 500_000


def _pick_tn(H, Dh, D2, Mp_nominal, budget_bytes):
    """Pick the lane-dense W2 tile width minimizing streamed bytes (incl.
    padding waste) + per-step overhead, subject to the VMEM budget."""
    best = None
    for tn in _TN_CANDIDATES:
        if tn != 128 and _vmem_estimate(Mp_nominal, H, Dh, tn) > budget_bytes:
            continue
        d2p = _round_up(D2, tn)
        cost = d2p * Dh * 2 + (d2p // tn) * _STEP_OVERHEAD_BYTES
        if best is None or cost < best[0]:
            best = (cost, tn)
    return best[1]


# ----------------------------------------------------------------------------
# Fused kernel: (x @ W1 + b1) -> tanh -> (@ W2 tile + b2 tile)
# ----------------------------------------------------------------------------

def _fused_prefix_mlp_kernel(x_ref, w1_ref, b1_ref, w2_ref, b2_ref, o_ref,
                             h_ref):
    # x_ref : (Mp, H)   bf16 gathered prefix embeddings (resident)
    # w1_ref: (H, Dh)   bf16 first Linear weight (resident)
    # b1_ref: (1, Dh)   f32  first Linear bias (resident)
    # w2_ref: (Dh, tn)  bf16 second Linear weight tile (streamed over D2)
    # b2_ref: (1, tn)   f32  second Linear bias tile
    # o_ref : (Mp, tn)  f32  output tile
    # h_ref : (Mp, Dh)  bf16 VMEM scratch, persists across the D2 grid

    @pl.when(pl.program_id(0) == 0)
    def _():
        acc1 = jnp.dot(x_ref[...], w1_ref[...],
                       preferred_element_type=jnp.float32)
        h_ref[...] = jnp.tanh(acc1 + b1_ref[...]).astype(h_ref.dtype)

    acc2 = jnp.dot(h_ref[...], w2_ref[...],
                   preferred_element_type=jnp.float32)
    o_ref[...] = (acc2 + b2_ref[...]).astype(o_ref.dtype)


def prefix_mlp(x, w1, b1, w2, b2, *, tn0, budget_bytes):
    """Fused Linear -> Tanh -> Linear.

    x: (M, H) bf16, w1: (H, Dh) bf16, b1: (1, Dh) f32,
    w2: (Dh, D2p) bf16 with D2p a multiple of tn0, b2: (1, D2p) f32.
    Returns (Mp, D2p) f32 -- the caller slices off padded rows/cols.
    """
    M, H = x.shape
    Dh = w1.shape[1]
    D2p = w2.shape[1]

    # bf16 LHS: pad rows to a multiple of 16 so tiles are native and unmasked.
    Mp = max(_round_up(M, 16), 16)
    if Mp != M:
        x = jnp.pad(x, ((0, Mp - M), (0, 0)))

    # Shrink tn if the actual batch pushes the estimate over budget; halving a
    # (power-of-two * 128) tile keeps it a divisor of D2p.
    tn = min(tn0, D2p)
    while tn > 128 and _vmem_estimate(Mp, H, Dh, tn) > budget_bytes:
        tn //= 2
    n_tiles = D2p // tn

    w2_spec_kwargs = {}
    if tn <= 512 and n_tiles >= 4:
        # Small tiles expose per-step DMA issue latency; pipeline deeper.
        w2_spec_kwargs["pipeline_mode"] = pl.Buffered(3)

    # TODO(synk): tile w1 over Dh if 2*H*Dh*2 bytes alone exceeds the VMEM
    # budget (extremely large hidden/prefix_hidden configs).
    return pl.pallas_call(
        _fused_prefix_mlp_kernel,
        out_shape=jax.ShapeDtypeStruct((Mp, D2p), jnp.float32),
        grid_spec=pltpu.PrefetchScalarGridSpec(
            num_scalar_prefetch=0,
            grid=(n_tiles,),
            in_specs=[
                pl.BlockSpec((Mp, H), lambda j: (0, 0)),   # x (resident)
                pl.BlockSpec((H, Dh), lambda j: (0, 0)),   # w1 (resident)
                pl.BlockSpec((1, Dh), lambda j: (0, 0)),   # b1 (resident)
                pl.BlockSpec((Dh, tn), lambda j: (0, j),   # w2 (streamed)
                             **w2_spec_kwargs),
                pl.BlockSpec((1, tn), lambda j: (0, j)),   # b2 (streamed)
            ],
            out_specs=pl.BlockSpec((Mp, tn), lambda j: (0, j)),
            scratch_shapes=[pltpu.VMEM((Mp, Dh), jnp.bfloat16)],
        ),
        compiler_params=pltpu.CompilerParams(
            # h scratch is written only at step 0 -> run the grid sequentially
            # on one core.
            dimension_semantics=("arbitrary",),
            vmem_limit_bytes=int(max(budget_bytes, 32 * 1024 * 1024)),
        ),
    )(x, w1, b1, w2, b2)


# ----------------------------------------------------------------------------
# Forward wrapper (jit-ed as one program)
# ----------------------------------------------------------------------------

def _prefix_forward(prefix, embedding, w1, b1, w2, b2, *, out_dim, tn0,
                    budget_bytes):
    B, P = prefix.shape
    H = embedding.shape[1]
    tok = jnp.take(embedding, prefix, axis=0)          # (B, P, H) f32 gather
    x = tok.reshape(B * P, H).astype(jnp.bfloat16)     # bf16 MXU LHS
    y = prefix_mlp(x, w1, b1, w2, b2, tn0=tn0, budget_bytes=budget_bytes)
    # Padded rows contain tanh(b1)-derived garbage and padded cols are junk
    # from zero-padded W2 columns: slice both off before reshaping.
    return y[:B * P, :out_dim].reshape(B, P, out_dim)


class PrefixEncoderPallas:
    """JAX/Pallas port of the PyTorch PrefixEncoder (forward only)."""

    def __init__(self, pre_seq_len, hidden_size, prefix_hidden_size,
                 num_hidden_layers, prefix_projection=True, key=None):
        self.prefix_projection = prefix_projection
        out_dim = num_hidden_layers * 2 * hidden_size
        self.out_dim = out_dim
        key = jax.random.PRNGKey(0) if key is None else key
        k_emb, k_w1, k_b1, k_w2, k_b2 = jax.random.split(key, 5)

        if prefix_projection:
            self.embedding = jax.random.normal(
                k_emb, (pre_seq_len, hidden_size), jnp.float32) * 0.02
            # Weights stored (in, out); bf16 (MXU-native, halves the W2 HBM
            # stream); biases stay f32.  Output stays f32 (torch fidelity).
            self.w1 = (jax.random.normal(
                k_w1, (hidden_size, prefix_hidden_size), jnp.float32)
                * 0.02).astype(jnp.bfloat16)
            self.b1 = jax.random.normal(
                k_b1, (1, prefix_hidden_size), jnp.float32) * 0.02
            w2 = (jax.random.normal(
                k_w2, (prefix_hidden_size, out_dim), jnp.float32)
                * 0.02).astype(jnp.bfloat16)
            b2 = jax.random.normal(
                k_b2, (1, out_dim), jnp.float32) * 0.02

            budget = _vmem_budget_bytes()
            mp_nominal = max(16, _round_up(pre_seq_len, 16))
            tn0 = _pick_tn(hidden_size, prefix_hidden_size, out_dim,
                           mp_nominal, budget)
            d2p = _round_up(out_dim, tn0)
            # Pad W2/b2 ONCE here so the per-call path never re-materializes
            # the (potentially huge) W2 in HBM.
            if d2p != out_dim:
                w2 = jnp.pad(w2, ((0, 0), (0, d2p - out_dim)))
                b2 = jnp.pad(b2, ((0, 0), (0, d2p - out_dim)))
            self.w2, self.b2 = w2, b2
            self._forward = jax.jit(functools.partial(
                _prefix_forward, out_dim=out_dim, tn0=tn0,
                budget_bytes=budget))
        else:
            # Pure embedding lookup path: plain-JAX gather, no matmul.
            self.embedding = jax.random.normal(
                k_emb, (pre_seq_len, out_dim), jnp.float32) * 0.02
            self._forward = jax.jit(
                lambda prefix, emb: jnp.take(emb, prefix, axis=0))

    def __call__(self, prefix):
        # prefix: (B, P) int32 token indices into the prefix embedding table.
        if self.prefix_projection:
            return self._forward(prefix, self.embedding, self.w1, self.b1,
                                 self.w2, self.b2)
        return self._forward(prefix, self.embedding)


if __name__ == "__main__":
    # Small, module-consistent config.
    batch = 2
    pre_seq_len = 8          # prefix length == embedding rows
    hidden_size = 32
    prefix_hidden_size = 64
    num_hidden_layers = 2    # output dim = 2 * 2 * 32 = 128

    key = jax.random.PRNGKey(0)
    enc = PrefixEncoderPallas(pre_seq_len, hidden_size, prefix_hidden_size,
                              num_hidden_layers, prefix_projection=True,
                              key=key)

    k_idx = jax.random.fold_in(key, 123)
    prefix = jax.random.randint(k_idx, (batch, pre_seq_len), 0, pre_seq_len,
                                dtype=jnp.int32)

    out = jax.block_until_ready(enc(prefix))

    # Pure-JAX reference following the same bf16-weight / f32-accumulate path.
    tok = jnp.take(enc.embedding, prefix, axis=0)                # (B, P, H)
    x = tok.reshape(batch * pre_seq_len, hidden_size).astype(jnp.bfloat16)
    h_ref = jnp.tanh(
        jnp.dot(x, enc.w1, preferred_element_type=jnp.float32) + enc.b1
    ).astype(jnp.bfloat16)
    y_ref = (jnp.dot(h_ref, enc.w2, preferred_element_type=jnp.float32)
             + enc.b2)[:, :enc.out_dim]
    ref = y_ref.reshape(batch, pre_seq_len, enc.out_dim)

    expected_shape = (batch, pre_seq_len, num_hidden_layers * 2 * hidden_size)
    assert out.shape == expected_shape, out.shape
    assert jnp.allclose(out, ref, atol=2e-2, rtol=2e-2), float(
        jnp.max(jnp.abs(out - ref)))

    print("KERNEL_OK")
</pallas_src>

<mosaic_0001>
module attributes {stable_mosaic.version = 11 : i64} {
  func.func @_fused_prefix_mlp_kernel(%arg0: i32, %arg1: memref<16x32xbf16, #tpu.memory_space<vmem>>, %arg2: memref<32x64xbf16, #tpu.memory_space<vmem>>, %arg3: memref<1x64xf32, #tpu.memory_space<vmem>>, %arg4: memref<64x128xbf16, #tpu.memory_space<vmem>>, %arg5: memref<1x128xf32, #tpu.memory_space<vmem>>, %arg6: memref<16x128xf32, #tpu.memory_space<vmem>>, %arg7: memref<16x64xbf16, #tpu.memory_space<vmem>>) attributes {dimension_semantics = [#tpu.dimension_semantics<arbitrary>], iteration_bounds = array<i64: 1>, scalar_prefetch = 0 : i64, scratch_operands = 1 : i64, tpu.core_type = #tpu.core_type<tc>, window_params = [{pipeline_mode = #tpu.pipeline_mode<synchronous>, transform_indices = @transform_0, window_bounds = array<i64: 16, 32>}, {pipeline_mode = #tpu.pipeline_mode<synchronous>, transform_indices = @transform_1, window_bounds = array<i64: 32, 64>}, {pipeline_mode = #tpu.pipeline_mode<synchronous>, transform_indices = @transform_2, window_bounds = array<i64: 1, 64>}, {transform_indices = @transform_3, window_bounds = array<i64: 64, 128>}, {transform_indices = @transform_4, window_bounds = array<i64: 1, 128>}, {transform_indices = @transform_5, window_bounds = array<i64: 16, 128>}]} {
    %c0_i32 = arith.constant 0 : i32
    %0 = arith.cmpi eq, %arg0, %c0_i32 : i32
    %1 = arith.extui %0 : i1 to i32
    %c0_i32_0 = arith.constant 0 : i32
    %2 = arith.cmpi ne, %1, %c0_i32_0 : i32
    scf.if %2 {
      %c0_8 = arith.constant 0 : index
      %c0_9 = arith.constant 0 : index
      %10 = vector.load %arg1[%c0_8, %c0_9] : memref<16x32xbf16, #tpu.memory_space<vmem>>, vector<16x32xbf16>
      %c0_10 = arith.constant 0 : index
      %c0_11 = arith.constant 0 : index
      %11 = vector.load %arg2[%c0_10, %c0_11] : memref<32x64xbf16, #tpu.memory_space<vmem>>, vector<32x64xbf16>
      %cst_12 = arith.constant dense<0.000000e+00> : vector<16x64xf32>
      %12 = tpu.matmul %10, %11, %cst_12 {dimension_numbers = #tpu.dot_dimension_numbers<[1], [0], [0], [1], [0, 0, 1, 1], [], []>} : vector<16x32xbf16>, vector<32x64xbf16>, vector<16x64xf32> -> vector<16x64xf32>
      %c0_13 = arith.constant 0 : index
      %c0_14 = arith.constant 0 : index
      %13 = vector.load %arg3[%c0_13, %c0_14] : memref<1x64xf32, #tpu.memory_space<vmem>>, vector<1x64xf32>
      %14 = vector.broadcast %13 : vector<1x64xf32> to vector<16x64xf32>
      %15 = arith.addf %12, %14 : vector<16x64xf32>
      %16 = math.tanh %15 : vector<16x64xf32>
      %17 = arith.truncf %16 : vector<16x64xf32> to vector<16x64xbf16>
      %c0_15 = arith.constant 0 : index
      %c0_16 = arith.constant 0 : index
      %18 = vector.load %arg7[%c0_15, %c0_16] : memref<16x64xbf16, #tpu.memory_space<vmem>>, vector<16x64xbf16>
      tpu.vector_store %arg7[%c0_15, %c0_16], %17 {strides = array<i32>} : memref<16x64xbf16, #tpu.memory_space<vmem>>, vector<16x64xbf16>,
    } else {
    }
    %c0 = arith.constant 0 : index
    %c0_1 = arith.constant 0 : index
    %3 = vector.load %arg7[%c0, %c0_1] : memref<16x64xbf16, #tpu.memory_space<vmem>>, vector<16x64xbf16>
    %c0_2 = arith.constant 0 : index
    %c0_3 = arith.constant 0 : index
    %4 = vector.load %arg4[%c0_2, %c0_3] : memref<64x128xbf16, #tpu.memory_space<vmem>>, vector<64x128xbf16>
    %cst = arith.constant dense<0.000000e+00> : vector<16x128xf32>
    %5 = tpu.matmul %3, %4, %cst {dimension_numbers = #tpu.dot_dimension_numbers<[1], [0], [0], [1], [0, 0, 1, 1], [], []>} : vector<16x64xbf16>, vector<64x128xbf16>, vector<16x128xf32> -> vector<16x128xf32>
    %c0_4 = arith.constant 0 : index
    %c0_5 = arith.constant 0 : index
    %6 = vector.load %arg5[%c0_4, %c0_5] : memref<1x128xf32, #tpu.memory_space<vmem>>, vector<1x128xf32>
    %7 = vector.broadcast %6 : vector<1x128xf32> to vector<16x128xf32>
    %8 = arith.addf %5, %7 : vector<16x128xf32>
    %c0_6 = arith.constant 0 : index
    %c0_7 = arith.constant 0 : index
    %9 = vector.load %arg6[%c0_6, %c0_7] : memref<16x128xf32, #tpu.memory_space<vmem>>, vector<16x128xf32>
    tpu.vector_store %arg6[%c0_6, %c0_7], %8 {strides = array<i32>} : memref<16x128xf32, #tpu.memory_space<vmem>>, vector<16x128xf32>,
    return
  }
  func.func @transform_0(%arg0: i32) -> (i32, i32) {
    %c0_i32 = arith.constant 0 : i32
    %c0_i32_0 = arith.constant 0 : i32
    %c0_i32_1 = arith.constant 0 : i32
    return %c0_i32, %c0_i32_0 : i32, i32
  }
  func.func @transform_1(%arg0: i32) -> (i32, i32) {
    %c0_i32 = arith.constant 0 : i32
    %c0_i32_0 = arith.constant 0 : i32
    %c0_i32_1 = arith.constant 0 : i32
    return %c0_i32, %c0_i32_0 : i32, i32
  }
  func.func @transform_2(%arg0: i32) -> (i32, i32) {
    %c0_i32 = arith.constant 0 : i32
    %c0_i32_0 = arith.constant 0 : i32
    %c0_i32_1 = arith.constant 0 : i32
    return %c0_i32, %c0_i32_0 : i32, i32
  }
  func.func @transform_3(%arg0: i32) -> (i32, i32) {
    %c0_i32 = arith.constant 0 : i32
    %c0_i32_0 = arith.constant 0 : i32
    return %c0_i32, %arg0 : i32, i32
  }
  func.func @transform_4(%arg0: i32) -> (i32, i32) {
    %c0_i32 = arith.constant 0 : i32
    %c0_i32_0 = arith.constant 0 : i32
    return %c0_i32, %arg0 : i32, i32
  }
  func.func @transform_5(%arg0: i32) -> (i32, i32) {
    %c0_i32 = arith.constant 0 : i32
    %c0_i32_0 = arith.constant 0 : i32
    return %c0_i32, %arg0 : i32, i32
  }
}

</mosaic_0001>

<bundles_post_ra>
// kernel: _prefix_forward.1
= control target key start
LH: loop header
LB: loop body
LE: loop exit
PB: predicated region body
PF: predicated region fallthrough
CT: control target
= control target key end

     0   :  { %v288_v1 = vmov 0.0   ;;  %vm289_vm0 = vmmov 0   ;;  %vm56_vm1 = vcmask 261120   ;;  %s362_s0 = inlined_call_operand.vmem [shape: bf16[16,32], index: 0, kind: input, shape index: {}]   ;;  %s363_s1 = inlined_call_operand.vmem [shape: bf16[32,64], index: 1, kind: input, shape index: {}]   ;;  %s364_s2 = inlined_call_operand.vmem [shape: f32[1,64], index: 2, kind: input, shape index: {}]   ;;  %s365_s3 = inlined_call_operand.vmem [shape: bf16[64,128], index: 3, kind: input, shape index: {}]   ;;  %s366_s4 = inlined_call_operand.vmem [shape: f32[1,128], index: 4, kind: input, shape index: {}]   ;;  %s367_s5 = inlined_call_operand.hbm [shape: f32[16,128], index: 5, kind: output, shape index: {}]  }
   0x1   :  { %v253_v0 = vld [vmem:[%s363_s1] sm:$0xff]   ;;  %228 = vmatprep.subr.bf16.mxu0 %v288_v1  ;;  %236 = vmatprep.subr.bf16.mxu1 %v288_v1  ;;  %v254_v2 = vld [vmem:[%s363_s1 + $0x8] sm:$0xff]  }
   0x2   :  { %229 = vmatpush3.bf16.msra.mxu0 %v253_v0  ;;  %232 = vmatprep.mubr.msk.bf16.mxu0 %vm289_vm0, %v288_v1  ;;  %v255_v3 = vld [vmem:[%s362_s0] sm:$0xff]  }
   0x3   :  { %230 = vmatprep.subr.bf16.mxu0 %v288_v1  ;;  %244 = vmatprep.mubr.msk.bf16.mxu1 %vm289_vm0, %v288_v1 }
   0x6   :  { %231 = vmatpush3.bf16.msra.mxu0 %v254_v2 }
   0x7   :  { %10 = vsyncpa [#allocation4], 0  ;;  %v256_v4 = vld [vmem:[%s365_s3] sm:$0xff]   ;;  %v257_v5 = vld [vmem:[%s365_s3 + $0x8] sm:$0xff]   ;;  %vm104_vm2 = vcmask 523264  }
   0x8   :  { %237 = vmatpush3.bf16.msra.mxu1 %v256_v4  ;;  %v258_v6 = vld [vmem:[%s365_s3 + $0x10] sm:$0xff]   ;;  %v259_v7 = vld [vmem:[%s365_s3 + $0x18] sm:$0xff]   ;;  %v209_v8 = vld [vmem:[%s364_s2] ss:$0 sm:$0xff]  ;;  %s290_s2 = smov [#allocation3]  }
   0x9   :  { %233 = vmatmul.mubr.msk.bf16.vlgmr.msra.gmra.mrb[0].mxu0 %vm56_vm1, %v255_v3  ;;  %238 = vmatprep.subr.bf16.mxu1 %v288_v1  ;;  %v214_v19 = vld [vmem:[%s366_s4] ss:$0 sm:$0xff]  ;;  %s198_s8 = sshll.u32 %s290_s2, 4  ;;  %s199_s8 = int_to_ptr.vmem [resolvable:$true] %s198_s8 }
   0xa   :  { %s264_s9 = scalar_lea.vmem %s199_s8, 256  ;;  %p269_p1 = scmp.lt.s32.totalorder %s199_s8, %s199_s8 }
   0xb   :  { %p265_p0 = scmp.ne.s32.totalorder %s199_s8, %s264_s9  ;;  %p270_p2 = scmp.lt.s32.totalorder %s264_s9, %s264_s9 }
   0xc   :  { %239 = vmatpush3.bf16.msra.mxu1 %v257_v5 }
   0xd   :  { %240 = vmatprep.subr.bf16.mxu1 %v288_v1  ;;  %p271_p3 = por %p270_p2, %p269_p1 }
   0xf   :  { %p272_p4 = pnand %p271_p3, %p265_p0 }
  0x10   :  { %241 = vmatpush3.bf16.msra.mxu1 %v258_v6 }
  0x11   :  { %242 = vmatprep.subr.bf16.mxu1 %v288_v1 }
  0x14   :  { %243 = vmatpush3.bf16.msra.mxu1 %v259_v7 }
  0xdc   :  { %v94_v9 = vpop.f32.mrb[0].mxu0 }
  0xdd   :  { %v95_v10 = vadd.f32 %v209_v8, %v94_v9  ;;  %v234_v11 = vpop.f32.mrb[1].mxu0 }
  0xde   :  { %v97_v12 = vpop.f32.mrb[2].mxu0 }
  0xdf   :  { %v98_v13 = vadd.f32 %v209_v8, %v97_v12  ;;  %v235_v14 = vpop.f32.mrb[3].mxu0  ;;  %260 = vtanh.f32 %v95_v10 }
  0xe1   :  { %262 = vtanh.f32 %v98_v13 }
  0xe9   :  { %v261_v15 = vpop.eup %260 }
  0xeb   :  { %v263_v16 = vpop.eup %262 }
  0xec   :  { %v103_v17 = vpack.c.bf16 %v263_v16, %v261_v15 }
  0xee   :  { %105 = vst.msk [vmem:[#allocation2] sm:$0xff] %vm104_vm2, %v103_v17 }
  0xf5   :  { %v106_v18 = vld [vmem:[#allocation2] sm:$0xff] }
  0xf6   :  { %245 = vmatmul.mubr.msk.bf16.vlgmr.msra.gmra.mrb[0].mxu1 %vm104_vm2, %v106_v18 }
 0x1c9   :  { %v184_v20 = vpop.f32.mrb[0].mxu1 }
 0x1ca   :  { %v185_v21 = vadd.f32 %v214_v19, %v184_v20  ;;  %v246_v22 = vpop.f32.mrb[1].mxu1 }
 0x1cb   :  { %v187_v23 = vpop.f32.mrb[2].mxu1 }
 0x1cc   :  { %191 = vst [vmem:[#allocation3] sm:$0xff] %v185_v21  ;;  %v188_v24 = vadd.f32 %v214_v19, %v187_v23  ;;  %v247_v25 = vpop.f32.mrb[3].mxu1 }
 0x1ce   :  { %192 = vst [vmem:[#allocation3 + $0x8] sm:$0xff] %v188_v24 }
 0x1cf   :  { %275 = shalt.err (!%p272_p4)
}
 0x1d0   :  { %s276_s11 = scalar_lea.hbm %s367_s5, 256 }
 0x1d1   :  { %p277_p5 = scmp.ne.s32.totalorder %s367_s5, %s276_s11  ;;  %p280_p6 = scmp.lt.u32.totalorder %s276_s11, %s367_s5 }
 0x1d3   :  { %p282_p7 = pnand %p280_p6, %p277_p5 }
 0x1d5   :  { %285 = shalt.err (!%p282_p7)
}
 0x1d6   :  { %s291_s16 = smov 128   ;;  %s292_s17 = smov 8  }
 0x1d7   :  { %204 = dma.vmem_to_hbm [thread:$0]  %s199_s8, 256, %s367_s5, [#allocation4], %s291_s16, %s291_s16, %s292_s17  }
 0x1d8   :  { %286 = dma.done.wait [#allocation4], 256  }
 0x1d9   :  { %287 = vsyncadd [#allocation4], 4294967040 }
 0x1da   :  { %208 = vsyncpa [#allocation4], 1 }

</bundles_post_ra>
